<compile_context>
chip_gen: v5e
topology: v5e:2x2
jax: 0.10.0
libtpu: 0.0.40
codegen_flags: <defaults>
</compile_context>

<pallas_src>
import functools
import math

import jax
import jax.numpy as jnp
from jax.experimental import pallas as pl
from jax.experimental.pallas import tpu as pltpu

_LANES = 128
_SUBLANES = 8


def _ceil_to(x, m):
    return ((x + m - 1) // m) * m


def _charbonnier_single_kernel(hr_ref, sr_ref, o_ref, *, eps, inv_n, n_pad):
    """Whole-array (un-gridded) path: everything resident in VMEM."""
    hr = hr_ref[...].astype(jnp.float32)
    sr = sr_ref[...].astype(jnp.float32)
    diff = hr - sr
    err = jnp.sqrt(diff * diff + eps)
    total = jnp.sum(err)
    if n_pad:
        # Padded tail elements are zero in BOTH inputs, so each contributes
        # exactly sqrt(eps) to the sum; subtract that constant instead of
        # masking (no iota / where in the hot path).
        total = total - jnp.float32(n_pad) * jnp.sqrt(jnp.float32(eps))
    o_ref[0, 0] = total * inv_n


def _charbonnier_tiled_kernel(hr_ref, sr_ref, o_ref, acc_ref, *, eps, inv_n,
                              n_pad):
    """Row-tiled path: partial sums accumulated in VMEM, finalized last step."""
    i = pl.program_id(0)

    @pl.when(i == 0)
    def _():
        acc_ref[...] = jnp.zeros_like(acc_ref)

    hr = hr_ref[...].astype(jnp.float32)
    sr = sr_ref[...].astype(jnp.float32)
    diff = hr - sr
    err = jnp.sqrt(diff * diff + eps)
    # Block-level reduce; the kernel is DMA-bound, so this is hidden filler.
    acc_ref[...] += jnp.sum(err)

    @pl.when(i == pl.num_programs(0) - 1)
    def _():
        total = acc_ref[0, 0]
        if n_pad:
            total = total - jnp.float32(n_pad) * jnp.sqrt(jnp.float32(eps))
        o_ref[0, 0] = total * inv_n


def charbonnier_loss(hr, sr, eps=1e-6, *, block_rows=4096,
                     single_block_max_rows=4096):
    """Pallas implementation of CharbonnierLoss.forward."""
    assert hr.shape == sr.shape, (hr.shape, sr.shape)
    assert block_rows % _SUBLANES == 0
    n = math.prod(hr.shape)

    # Lane-dense layout: flatten to (rows, 128) so every VPU op / reduction
    # runs at full lane utilization.  The contiguous reshape is layout
    # plumbing only; zero-padding (if any) is corrected for in the kernel.
    rows = _ceil_to(max(pl.cdiv(n, _LANES), 1), _SUBLANES)
    use_single = rows <= single_block_max_rows
    if not use_single:
        rows = _ceil_to(rows, block_rows)
    n_padded = rows * _LANES
    n_pad = n_padded - n

    hr_flat = hr.reshape(-1)
    sr_flat = sr.reshape(-1)
    if n_pad:
        hr_flat = jnp.pad(hr_flat, (0, n_pad))
        sr_flat = jnp.pad(sr_flat, (0, n_pad))
    hr2 = hr_flat.reshape(rows, _LANES)
    sr2 = sr_flat.reshape(rows, _LANES)

    if use_single:
        # No grid: a size-1 grid is pure pipeline/loop overhead at this size.
        out = pl.pallas_call(
            functools.partial(_charbonnier_single_kernel, eps=float(eps),
                              inv_n=1.0 / n, n_pad=n_pad),
            out_shape=jax.ShapeDtypeStruct((1, 1), jnp.float32),
            in_specs=[pl.BlockSpec(memory_space=pltpu.MemorySpace.VMEM),
                      pl.BlockSpec(memory_space=pltpu.MemorySpace.VMEM)],
            out_specs=pl.BlockSpec(memory_space=pltpu.MemorySpace.SMEM),
        )(hr2, sr2)
    else:
        grid = (rows // block_rows,)
        out = pl.pallas_call(
            functools.partial(_charbonnier_tiled_kernel, eps=float(eps),
                              inv_n=1.0 / n, n_pad=n_pad),
            out_shape=jax.ShapeDtypeStruct((1, 1), jnp.float32),
            grid=grid,
            in_specs=[pl.BlockSpec((block_rows, _LANES), lambda i: (i, 0)),
                      pl.BlockSpec((block_rows, _LANES), lambda i: (i, 0))],
            out_specs=pl.BlockSpec(memory_space=pltpu.MemorySpace.SMEM),
            scratch_shapes=[pltpu.VMEM((1, 1), jnp.float32)],
            compiler_params=pltpu.CompilerParams(
                dimension_semantics=("arbitrary",),
                vmem_limit_bytes=32 * 1024 * 1024),
        )(hr2, sr2)
    return out[0, 0]


def _reference_loss(hr, sr, eps=1e-6):
    """Pure-JAX reference mirroring the PyTorch forward, for verification."""
    diff = hr.astype(jnp.float32) - sr.astype(jnp.float32)
    return jnp.mean(jnp.sqrt(diff * diff + eps))


if __name__ == "__main__":
    key = jax.random.PRNGKey(0)
    k1, k2 = jax.random.split(key)

    # Small shapes consistent with an image-restoration loss: (B, C, H, W).
    shape = (2, 4, 16, 16)
    hr = jax.random.normal(k1, shape, dtype=jnp.float32)
    sr = hr + 0.1 * jax.random.normal(k2, shape, dtype=jnp.float32)

    # 1) Single-block (un-gridded) path.
    loss = jax.block_until_ready(charbonnier_loss(hr, sr))
    ref = jax.block_until_ready(_reference_loss(hr, sr))
    assert jnp.allclose(loss, ref, rtol=1e-5, atol=1e-6), (loss, ref)

    # 2) Ragged element count exercising the zero-pad correction.
    shape2 = (2, 3, 7, 5)
    hr_r = jax.random.normal(k1, shape2, dtype=jnp.float32)
    sr_r = jax.random.normal(k2, shape2, dtype=jnp.float32)
    loss2 = jax.block_until_ready(charbonnier_loss(hr_r, sr_r))
    ref2 = jax.block_until_ready(_reference_loss(hr_r, sr_r))
    assert jnp.allclose(loss2, ref2, rtol=1e-5, atol=1e-6), (loss2, ref2)

    # 3) Force the row-tiled accumulator path (used for large inputs).
    loss3 = jax.block_until_ready(
        charbonnier_loss(hr, sr, block_rows=8, single_block_max_rows=8))
    assert jnp.allclose(loss3, ref, rtol=1e-5, atol=1e-6), (loss3, ref)

    # 4) Tiled path with a ragged (padded) element count.
    loss4 = jax.block_until_ready(
        charbonnier_loss(hr_r, sr_r, block_rows=8, single_block_max_rows=4))
    assert jnp.allclose(loss4, ref2, rtol=1e-5, atol=1e-6), (loss4, ref2)

    # 5) bf16 inputs (kernel upcasts to f32 on the VPU).
    loss5 = jax.block_until_ready(
        charbonnier_loss(hr.astype(jnp.bfloat16), sr.astype(jnp.bfloat16)))
    ref5 = jax.block_until_ready(
        _reference_loss(hr.astype(jnp.bfloat16), sr.astype(jnp.bfloat16)))
    assert jnp.allclose(loss5, ref5, rtol=1e-3, atol=1e-3), (loss5, ref5)

    print("KERNEL_OK")
</pallas_src>

<mosaic_0001>
module attributes {stable_mosaic.version = 11 : i64} {
  func.func @_charbonnier_single_kernel(%arg0: memref<16x128xf32, #tpu.memory_space<vmem>>, %arg1: memref<16x128xf32, #tpu.memory_space<vmem>>, %arg2: memref<1x1xf32, #tpu.memory_space<smem>>) attributes {dimension_semantics = [], scalar_prefetch = 0 : i64, scratch_operands = 0 : i64, tpu.core_type = #tpu.core_type<tc>} {
    %c0 = arith.constant 0 : index
    %c0_0 = arith.constant 0 : index
    %0 = vector.load %arg0[%c0, %c0_0] : memref<16x128xf32, #tpu.memory_space<vmem>>, vector<16x128xf32>
    %c0_1 = arith.constant 0 : index
    %c0_2 = arith.constant 0 : index
    %1 = vector.load %arg1[%c0_1, %c0_2] : memref<16x128xf32, #tpu.memory_space<vmem>>, vector<16x128xf32>
    %2 = arith.subf %0, %1 : vector<16x128xf32>
    %3 = arith.mulf %2, %2 : vector<16x128xf32>
    %cst = arith.constant 9.99999997E-7 : f32
    %4 = vector.broadcast %cst : f32 to vector<16x128xf32>
    %5 = arith.addf %3, %4 : vector<16x128xf32>
    %6 = math.sqrt %5 : vector<16x128xf32>
    %7 = vector.shape_cast %6 : vector<16x128xf32> to vector<1x16x128xf32>
    %cst_3 = arith.constant dense<0.000000e+00> : vector<1xf32>
    %8 = vector.multi_reduction <add>, %7, %cst_3 [1, 2] : vector<1x16x128xf32> to vector<1xf32>
    %9 = vector.shape_cast %8 : vector<1xf32> to vector<1x1x1xf32>
    %10 = vector.extract %9[0, 0, 0] : f32 from vector<1x1x1xf32>
    %cst_4 = arith.constant 4.8828125E-4 : f32
    %11 = arith.mulf %10, %cst_4 : f32
    %c0_5 = arith.constant 0 : index
    %c0_6 = arith.constant 0 : index
    %12 = memref.load %arg2[%c0_5, %c0_6] : memref<1x1xf32, #tpu.memory_space<smem>>
    memref.store %11, %arg2[%c0_5, %c0_6] : memref<1x1xf32, #tpu.memory_space<smem>>
    return
  }
}

</mosaic_0001>

<bundles_post_ra>
// kernel: tpu_custom_call.1
= control target key start
LH: loop header
LB: loop body
LE: loop exit
PB: predicated region body
PF: predicated region fallthrough
CT: control target
= control target key end

     0   :  { %7 = vsyncpa [#allocation3], 0  ;;  %s214_s0 = inlined_call_operand.hbm [shape: f32[16,128], index: 0, kind: input, shape index: {}]   ;;  %s215_s1 = inlined_call_operand.hbm [shape: f32[16,128], index: 1, kind: input, shape index: {}]   ;;  %s216_s2 = inlined_call_operand.hbm [shape: f32[1,1], index: 2, kind: output, shape index: {}]  }
   0x1   :  { %8 = vsyncpa [#allocation6], 0 }
   0x2   :  { %9 = vsyncpa [#allocation4], 0  ;;  %s14_s11 = sshll.u32 %s214_s0, 4  ;;  %s185_s12 = smov [#allocation2]   ;;  %s15_s11 = int_to_ptr.hbm [resolvable:$true] %s14_s11 }
   0x3   :  { %s16_s13 = sshll.u32 %s185_s12, 4  ;;  %s27_s16 = sshll.u32 %s215_s1, 4  ;;  %s17_s13 = int_to_ptr.vmem [resolvable:$true] %s16_s13  ;;  %s28_s16 = int_to_ptr.hbm [resolvable:$true] %s27_s16 }
   0x4   :  { %s186_s17 = smov 128   ;;  %s187_s18 = smov 8  }
   0x5   :  { %22 = dma.hbm_to_vmem [thread:$0]  %s15_s11, 256, %s17_s13, [#allocation3], %s186_s17, %s186_s17, %s187_s18  }
   0x6   :  { %s188_s19 = smov [#allocation5]  }
   0x7   :  { %s29_s20 = sshll.u32 %s188_s19, 4  ;;  %s30_s20 = int_to_ptr.vmem [resolvable:$true] %s29_s20 }
   0x8   :  { %35 = dma.hbm_to_vmem [thread:$0]  %s28_s16, 256, %s30_s20, [#allocation6], %s186_s17, %s186_s17, %s187_s18  }
   0x9   :  { %179 = dma.done.wait [#allocation3], 256  }
   0xa   :  { %180 = vsyncadd [#allocation3], 4294967040 }
   0xb   :  { %181 = dma.done.wait [#allocation6], 256  }
   0xc   :  { %182 = vsyncadd [#allocation6], 4294967040  ;;  %v44_v0 = vld [vmem:[#allocation2] sm:$0xff]  ;;  %v45_v1 = vld [vmem:[#allocation2 + $0x8] sm:$0xff]  ;;  %s96_s21 = sshll.u32 %s216_s2, 4  ;;  %s189_s24 = smov [#allocation7]   ;;  %s97_s21 = int_to_ptr.hbm [resolvable:$true] %s96_s21 }
   0xd   :  { %v46_v2 = vld [vmem:[#allocation5] sm:$0xff]  ;;  %v47_v3 = vld [vmem:[#allocation5 + $0x8] sm:$0xff] }
   0xe   :  { %v48_v4 = vsub.f32 %v44_v0, %v46_v2  ;;  %v49_v5 = vsub.f32 %v45_v1, %v47_v3 }
  0x10   :  { %v50_v6 = vmul.f32 %v48_v4, %v48_v4  ;;  %v51_v7 = vmul.f32 %v49_v5, %v49_v5 }
  0x12   :  { %v52_v8 = vadd.f32 1e-06, %v50_v6  ;;  %v53_v9 = vadd.f32 1e-06, %v51_v7 }
  0x14   :  { %115 = vrsqrt.f32 %v52_v8  ;;  %vm61_vm0 = vcmp.eq.f32.partialorder %v52_v8, inf  ;;  %v64_v21 = vand.u32 2147483648, %v52_v8  ;;  %vm63_vm1 = vcmp.eq.f32.partialorder %v52_v8, 0.0 }
  0x15   :  { %117 = vrsqrt.f32 %v53_v9  ;;  %vm73_vm2 = vcmp.eq.f32.partialorder %v53_v9, inf  ;;  %v76_v24 = vand.u32 2147483648, %v53_v9  ;;  %vm75_vm3 = vcmp.eq.f32.partialorder %v53_v9, 0.0 }
  0x1a   :  { %v116_v10 = vpop.eup %115 }
  0x1b   :  { %v118_v11 = vpop.eup %117  ;;  %v55_v12 = vmul.f32 %v116_v10, %v52_v8 }
  0x1c   :  { %v67_v13 = vmul.f32 %v118_v11, %v53_v9 }
  0x1d   :  { %v56_v14 = vmul.f32 %v116_v10, %v55_v12 }
  0x1e   :  { %v68_v15 = vmul.f32 %v118_v11, %v67_v13 }
  0x1f   :  { %v57_v16 = vmul.f32 0.5, %v56_v14 }
  0x20   :  { %v69_v17 = vmul.f32 0.5, %v68_v15 }
  0x21   :  { %v58_v18 = vsub.f32 1.5, %v57_v16 }
  0x22   :  { %v70_v19 = vsub.f32 1.5, %v69_v17 }
  0x23   :  { %v59_v20 = vmul.f32 %v116_v10, %v58_v18 }
  0x24   :  { %v71_v22 = vmul.f32 %v118_v11, %v70_v19 }
  0x25   :  { %v60_v23 = vmul.f32 %v59_v20, %v52_v8 }
  0x26   :  { %v72_v25 = vmul.f32 %v71_v22, %v53_v9 }
  0x27   :  { %v62_v26 = vsel %vm61_vm0, %v52_v8, %v60_v23 }
  0x28   :  { %v65_v27 = vsel %vm63_vm1, %v64_v21, %v62_v26  ;;  %v74_v28 = vsel %vm73_vm2, %v53_v9, %v72_v25 }
  0x29   :  { %v77_v29 = vsel %vm75_vm3, %v76_v24, %v74_v28 }
  0x2a   :  { %v78_v30 = vadd.f32 %v77_v29, %v65_v27 }
  0x2c   :  { %79 = vadd.xlane.f32.xlu0 %v78_v30 }
  0x9f   :  { %v80_v31 = vpop.xlane.xlu0 %79 }
  0xa0   :  { %v81_v32 = vrot.slane %v80_v31, 4 }
  0xa2   :  { %v82_v33 = vadd.f32 %v81_v32, %v80_v31 }
  0xa4   :  { %v83_v34 = vrot.slane %v82_v33, 2 }
  0xa6   :  { %v84_v35 = vadd.f32 %v83_v34, %v82_v33 }
  0xa8   :  { %v85_v36 = vrot.slane %v84_v35, 1 }
  0xaa   :  { %v86_v37 = vadd.f32 %v85_v36, %v84_v35 }
  0xac   :  { %108 = vpush %v86_v37 }
  0xdd   :  { %s109_s22 = spop %108 }
  0xde   :  { %s88_s23 = smul.f32 0.00048828125, %s109_s22 }
  0xe0   :  { %90 = sst [smem:[#allocation7]] %s88_s23 }
  0xe1   :  { %99 = dma.smem_to_hbm %s189_s24, 16, %s97_s21, [#allocation4]  }
  0xe2   :  { %183 = dma.done.wait [#allocation4], 16  }
  0xe3   :  { %184 = vsyncadd [#allocation4], 4294967280 }
  0xe4   :  { %104 = sfence }
  0xe5   :  { %105 = vsyncpa [#allocation3], 1 }
  0xe6   :  { %106 = vsyncpa [#allocation6], 1 }
  0xe7   :  { %107 = vsyncpa [#allocation4], 1 }

</bundles_post_ra>
